<compile_context>
chip_gen: v6e
topology: v6e:2x2x1
jax: 0.10.0
libtpu: 0.0.40
codegen_flags: <defaults>
</compile_context>

<pallas_src>
import jax
import jax.numpy as jnp
from jax.experimental import pallas as pl
from jax.experimental.pallas import tpu as pltpu


def _make_kernel(B, T, E, H, V_pad):
    """Build the no-grid kernel for static (B, T, E, H, V_pad)."""
    TP1 = T + 1          # T real timesteps + 1 wavefront drain step (bias-only slot)

    def kernel(tok_ref,   # (TP1*B, 1) int32, time-major (row s*B + b); last B rows = -1 sentinel
               emb_ref,   # (V_pad, E) f32 embedding table (zero-padded vocab)
               w_ref,     # (2H+E+2, 8H) f32 packed params:
                          #   rows 0:2H      = W_rec  [[Whh0, Wih1],[0, Whh1]] (interleaved cols)
                          #   rows 2H:2H+E   = Wih0_big (layer-0 cols, zeros in layer-1 cols)
                          #   row  2H+E      = bias (b0|b1 interleaved)
                          #   row  2H+E+1    = classifier: lanes 0:H = wc, lane H = bc
               o_ref,     # (B, 1) f32 sigmoid scores
               gx_ref):   # VMEM scratch (TP1*B, 8H) f32
        # ---- hoisted parameter views (read once, outside the serial loop) ----
        w_rec = w_ref[0:2 * H, :]                             # (2H, 8H)
        wih0 = w_ref[2 * H:2 * H + E, :]                      # (E, 8H)
        bias = w_ref[2 * H + E:2 * H + E + 1, :]              # (1, 8H)
        cls = w_ref[2 * H + E + 1:2 * H + E + 2, :]           # (1, 8H)

        # ---- prologue: in-kernel embedding (one-hot matmul) + time-parallel layer-0
        #      input projection, one chained MXU pass over all timesteps. Stored to
        #      VMEM scratch to bound vreg pressure in the unrolled recurrence.
        tok = tok_ref[...]                                                   # (TP1*B, 1)
        vocab_iota = jax.lax.broadcasted_iota(jnp.int32, (TP1 * B, V_pad), 1)
        onehot = (vocab_iota == tok).astype(jnp.float32)                     # (TP1*B, V_pad)
        x = jnp.dot(onehot, emb_ref[...], preferred_element_type=jnp.float32)   # (TP1*B, E)
        gx_ref[...] = (jnp.dot(x, wih0, preferred_element_type=jnp.float32)
                       + bias)                                               # (TP1*B, 8H)

        # ---- wavefront recurrence: joint state, lanes 0:H = layer 0, H:2H = layer 1.
        h01 = jnp.zeros((B, 2 * H), jnp.float32)
        c01 = jnp.zeros((B, 2 * H), jnp.float32)
        lane = jax.lax.broadcasted_iota(jnp.int32, (B, 2 * H), 1)
        l0_mask = (lane < H).astype(jnp.float32)   # used only at step 0

        for s in range(TP1):
            g_in = gx_ref[s * B:(s + 1) * B, :]                               # (B, 8H)
            if s == 0:
                gates = g_in                  # h01 == 0 -> recurrent term is zero, skip MXU
            else:
                # One fused MXU push: layer-0 recurrent gates (time s) + layer-1 full
                # gates (time s-1), gate-major / layer-interleaved columns.
                gates = g_in + jnp.dot(h01, w_rec, preferred_element_type=jnp.float32)

            sig = jax.nn.sigmoid(gates)                  # i,f,o in one full-vreg EUP pass
            i01 = sig[:, 0 * H:2 * H]
            f01 = sig[:, 2 * H:4 * H]
            g01 = jnp.tanh(gates[:, 4 * H:6 * H])        # tanh only on the g-gate lanes
            o01 = sig[:, 6 * H:8 * H]
            if s == 0:
                # Layer-1 is still "before time 0": keep its half of the state at zero.
                i01 = i01 * l0_mask
                o01 = o01 * l0_mask
            c01 = f01 * c01 + i01 * g01
            h01 = o01 * jnp.tanh(c01)
        # After step s = T, lanes H:2H of h01 hold h1_{T-1} (last layer-1 hidden state).

        # ---- classifier on VPU/XLU: elementwise mul + lane reduce (no MXU push) ----
        h_last = h01[:, H:2 * H]                         # (B, H)
        wc = cls[:, 0:H]                                 # (1, H)
        bc = cls[:, H:H + 1]                             # (1, 1)
        logits = jnp.sum(h_last * wc, axis=-1, keepdims=True) + bc
        o_ref[...] = jax.nn.sigmoid(logits)

    return kernel


@jax.jit
def lstm_net_forward(tokens, params):
    """tokens: (B, T) int32.  Returns (B, 1) float32 sigmoid scores."""
    emb = params["embedding"]                 # (V, E)
    B, T = tokens.shape
    V, E = emb.shape
    H = params["whh0"].shape[0]
    V_pad = ((V + 127) // 128) * 128          # lane-friendly one-hot / contraction dim

    # Zero-padded embedding table.
    emb_p = jnp.zeros((V_pad, E), jnp.float32).at[:V, :].set(emb)

    # Tokens in time-major flat layout (row s*B + b) plus B sentinel (-1) rows whose
    # one-hot is all-zero, so gx row-block T holds the bias only (wavefront drain step).
    tok_flat = jnp.concatenate(
        [tokens.T.reshape(-1).astype(jnp.int32),
         jnp.full((B,), -1, jnp.int32)]).reshape(-1, 1)

    # Gate-major, layer-interleaved column layout for the fused wavefront weights:
    # for gate k in [i,f,g,o]: cols [2k*H:(2k+1)*H] = layer 0, [(2k+1)*H:(2k+2)*H] = layer 1.
    def interleave(a, b):     # (R, 4H), (R, 4H) -> (R, 8H)
        R = a.shape[0]
        return jnp.stack([a.reshape(R, 4, H), b.reshape(R, 4, H)], axis=2).reshape(R, 8 * H)

    w_rec = jnp.concatenate([
        interleave(params["whh0"], params["wih1"]),                       # h0 rows
        interleave(jnp.zeros_like(params["whh1"]), params["whh1"]),       # h1 rows
    ], axis=0)                                                            # (2H, 8H)
    wih0_big = interleave(params["wih0"], jnp.zeros_like(params["wih0"]))  # (E, 8H)
    bias_full = interleave(params["b0"], params["b1"])                     # (1, 8H)
    cls_row = jnp.zeros((1, 8 * H), jnp.float32)
    cls_row = cls_row.at[0, :H].set(params["wc"][:, 0]).at[0, H].set(params["bc"][0, 0])

    # One packed parameter slab -> a single input DMA for all weights/biases.
    w_slab = jnp.concatenate([w_rec, wih0_big, bias_full, cls_row], axis=0)  # (2H+E+2, 8H)

    kernel = _make_kernel(B, T, E, H, V_pad)
    vmem = lambda: pl.BlockSpec(memory_space=pltpu.MemorySpace.VMEM)
    out = pl.pallas_call(
        kernel,
        out_shape=jax.ShapeDtypeStruct((B, 1), jnp.float32),
        in_specs=[vmem(), vmem(), vmem()],
        out_specs=vmem(),
        scratch_shapes=[pltpu.VMEM(((T + 1) * B, 8 * H), jnp.float32)],
    )(tok_flat, emb_p, w_slab)
    return out


# ----------------------------- pure-JAX reference ---------------------------------
def _ref_gates(gates, c_prev, H):
    i = jax.nn.sigmoid(gates[:, 0 * H:1 * H])
    f = jax.nn.sigmoid(gates[:, 1 * H:2 * H])
    g = jnp.tanh(gates[:, 2 * H:3 * H])
    o = jax.nn.sigmoid(gates[:, 3 * H:4 * H])
    c_new = f * c_prev + i * g
    return o * jnp.tanh(c_new), c_new


def reference_forward(tokens, params):
    """Pure-JAX reference matching torch.nn.LSTM(batch_first=True) semantics."""
    x = jnp.take(params["embedding"], tokens, axis=0)  # (B, T, E)
    B = x.shape[0]
    H = params["whh0"].shape[0]

    def layer(xs, w_ih, w_hh, b):
        def step(carry, x_t):
            h, c = carry
            gates = x_t @ w_ih + h @ w_hh + b
            h, c = _ref_gates(gates, c, H)
            return (h, c), h
        h0 = jnp.zeros((B, H), jnp.float32)
        c0 = jnp.zeros((B, H), jnp.float32)
        _, hs = jax.lax.scan(step, (h0, c0), jnp.transpose(xs, (1, 0, 2)))
        return jnp.transpose(hs, (1, 0, 2))  # (B, T, H)

    h = layer(x, params["wih0"], params["whh0"], params["b0"])
    h = layer(h, params["wih1"], params["whh1"], params["b1"])
    last = h[:, -1, :]
    return jax.nn.sigmoid(last @ params["wc"] + params["bc"])


def make_params(key, vocab, embedding_dim, hidden_dim):
    ks = jax.random.split(key, 12)
    s = 1.0 / jnp.sqrt(hidden_dim)
    u = lambda k, shape: jax.random.uniform(k, shape, jnp.float32, -s, s)
    return {
        "embedding": jax.random.normal(ks[0], (vocab, embedding_dim), jnp.float32),
        # layer 0 (input size = embedding_dim); weights stored transposed: (in, 4H), gate order [i,f,g,o]
        "wih0": u(ks[1], (embedding_dim, 4 * hidden_dim)),
        "whh0": u(ks[2], (hidden_dim, 4 * hidden_dim)),
        "b0": u(ks[3], (1, 4 * hidden_dim)) + u(ks[4], (1, 4 * hidden_dim)),  # b_ih + b_hh
        # layer 1 (input size = hidden_dim)
        "wih1": u(ks[5], (hidden_dim, 4 * hidden_dim)),
        "whh1": u(ks[6], (hidden_dim, 4 * hidden_dim)),
        "b1": u(ks[7], (1, 4 * hidden_dim)) + u(ks[8], (1, 4 * hidden_dim)),
        # classifier Linear(hidden_dim, 1)
        "wc": u(ks[9], (hidden_dim, 1)),
        "bc": u(ks[10], (1, 1)),
    }


if __name__ == "__main__":
    B, T = 8, 8
    VOCAB, E, H = 50, 16, 32
    key = jax.random.PRNGKey(0)
    k_tok, k_par = jax.random.split(key)

    tokens = jax.random.randint(k_tok, (B, T), 0, VOCAB, dtype=jnp.int32)
    params = make_params(k_par, VOCAB, E, H)

    out = lstm_net_forward(tokens, params)
    out = jax.block_until_ready(out)

    ref = reference_forward(tokens, params)
    assert out.shape == (B, 1)
    assert jnp.allclose(out, ref, atol=1e-4, rtol=1e-4), (out, ref)

    print("KERNEL_OK")
</pallas_src>

<mosaic_0001>
module attributes {stable_mosaic.version = 11 : i64} {
  func.func @kernel(%arg0: memref<72x1xi32, #tpu.memory_space<vmem>>, %arg1: memref<128x16xf32, #tpu.memory_space<vmem>>, %arg2: memref<82x256xf32, #tpu.memory_space<vmem>>, %arg3: memref<8x1xf32, #tpu.memory_space<vmem>>, %arg4: memref<72x256xf32, #tpu.memory_space<vmem>>) attributes {dimension_semantics = [], scalar_prefetch = 0 : i64, scratch_operands = 1 : i64, tpu.core_type = #tpu.core_type<tc>} {
    %c0 = arith.constant 0 : index
    %c0_0 = arith.constant 0 : index
    %0 = vector.load %arg2[%c0, %c0_0] : memref<82x256xf32, #tpu.memory_space<vmem>>, vector<64x256xf32>
    %c64 = arith.constant 64 : index
    %c0_1 = arith.constant 0 : index
    %1 = vector.load %arg2[%c64, %c0_1] : memref<82x256xf32, #tpu.memory_space<vmem>>, vector<16x256xf32>
    %c80 = arith.constant 80 : index
    %c0_2 = arith.constant 0 : index
    %2 = vector.load %arg2[%c80, %c0_2] : memref<82x256xf32, #tpu.memory_space<vmem>>, vector<1x256xf32>
    %c81 = arith.constant 81 : index
    %c0_3 = arith.constant 0 : index
    %3 = vector.load %arg2[%c81, %c0_3] : memref<82x256xf32, #tpu.memory_space<vmem>>, vector<1x256xf32>
    %c0_4 = arith.constant 0 : index
    %c0_5 = arith.constant 0 : index
    %4 = vector.load %arg0[%c0_4, %c0_5] : memref<72x1xi32, #tpu.memory_space<vmem>>, vector<72x1xi32>
    %5 = tpu.iota {dimensions = array<i32: 1>} : vector<72x128xi32>
    %6 = vector.broadcast %4 : vector<72x1xi32> to vector<72x128xi32>
    %7 = arith.cmpi eq, %5, %6 : vector<72x128xi32>
    %8 = arith.extui %7 : vector<72x128xi1> to vector<72x128xi32>
    %9 = arith.sitofp %8 : vector<72x128xi32> to vector<72x128xf32>
    %c0_6 = arith.constant 0 : index
    %c0_7 = arith.constant 0 : index
    %10 = vector.load %arg1[%c0_6, %c0_7] : memref<128x16xf32, #tpu.memory_space<vmem>>, vector<128x16xf32>
    %cst = arith.constant dense<0.000000e+00> : vector<72x16xf32>
    %11 = tpu.matmul %9, %10, %cst {dimension_numbers = #tpu.dot_dimension_numbers<[1], [0], [0], [1], [0, 0, 1, 1], [], []>} : vector<72x128xf32>, vector<128x16xf32>, vector<72x16xf32> -> vector<72x16xf32>
    %cst_8 = arith.constant dense<0.000000e+00> : vector<72x256xf32>
    %12 = tpu.matmul %11, %1, %cst_8 {dimension_numbers = #tpu.dot_dimension_numbers<[1], [0], [0], [1], [0, 0, 1, 1], [], []>} : vector<72x16xf32>, vector<16x256xf32>, vector<72x256xf32> -> vector<72x256xf32>
    %13 = vector.broadcast %2 : vector<1x256xf32> to vector<72x256xf32>
    %14 = arith.addf %12, %13 : vector<72x256xf32>
    %c0_9 = arith.constant 0 : index
    %c0_10 = arith.constant 0 : index
    %15 = vector.load %arg4[%c0_9, %c0_10] : memref<72x256xf32, #tpu.memory_space<vmem>>, vector<72x256xf32>
    tpu.vector_store %arg4[%c0_9, %c0_10], %14 {strides = array<i32>} : memref<72x256xf32, #tpu.memory_space<vmem>>, vector<72x256xf32>,
    %cst_11 = arith.constant 0.000000e+00 : f32
    %16 = vector.broadcast %cst_11 : f32 to vector<8x64xf32>
    %17 = tpu.iota {dimensions = array<i32: 1>} : vector<8x64xi32>
    %c32_i32 = arith.constant 32 : i32
    %18 = vector.broadcast %c32_i32 : i32 to vector<8x64xi32>
    %19 = arith.cmpi slt, %17, %18 : vector<8x64xi32>
    %20 = arith.extui %19 : vector<8x64xi1> to vector<8x64xi32>
    %21 = arith.sitofp %20 : vector<8x64xi32> to vector<8x64xf32>
    %c0_12 = arith.constant 0 : index
    %c0_13 = arith.constant 0 : index
    %22 = vector.load %arg4[%c0_12, %c0_13] : memref<72x256xf32, #tpu.memory_space<vmem>>, vector<8x256xf32>
    %23 = arith.negf %22 : vector<8x256xf32>
    %24 = math.exp %23 : vector<8x256xf32>
    %cst_14 = arith.constant 1.000000e+00 : f32
    %25 = vector.broadcast %cst_14 : f32 to vector<8x256xf32>
    %26 = arith.addf %25, %24 : vector<8x256xf32>
    %27 = arith.divf %25, %26 : vector<8x256xf32>
    %28 = vector.extract_strided_slice %27 {offsets = [0, 0], sizes = [8, 64], strides = [1, 1]} : vector<8x256xf32> to vector<8x64xf32>
    %29 = vector.extract_strided_slice %27 {offsets = [0, 64], sizes = [8, 64], strides = [1, 1]} : vector<8x256xf32> to vector<8x64xf32>
    %30 = vector.extract_strided_slice %22 {offsets = [0, 128], sizes = [8, 64], strides = [1, 1]} : vector<8x256xf32> to vector<8x64xf32>
    %31 = math.tanh %30 : vector<8x64xf32>
    %32 = vector.extract_strided_slice %27 {offsets = [0, 192], sizes = [8, 64], strides = [1, 1]} : vector<8x256xf32> to vector<8x64xf32>
    %33 = arith.mulf %28, %21 : vector<8x64xf32>
    %34 = arith.mulf %32, %21 : vector<8x64xf32>
    %35 = arith.mulf %29, %16 : vector<8x64xf32>
    %36 = arith.mulf %33, %31 : vector<8x64xf32>
    %37 = arith.addf %35, %36 : vector<8x64xf32>
    %38 = math.tanh %37 : vector<8x64xf32>
    %39 = arith.mulf %34, %38 : vector<8x64xf32>
    %c8 = arith.constant 8 : index
    %c0_15 = arith.constant 0 : index
    %40 = vector.load %arg4[%c8, %c0_15] : memref<72x256xf32, #tpu.memory_space<vmem>>, vector<8x256xf32>
    %cst_16 = arith.constant dense<0.000000e+00> : vector<8x256xf32>
    %41 = tpu.matmul %39, %0, %cst_16 {dimension_numbers = #tpu.dot_dimension_numbers<[1], [0], [0], [1], [0, 0, 1, 1], [], []>} : vector<8x64xf32>, vector<64x256xf32>, vector<8x256xf32> -> vector<8x256xf32>
    %42 = arith.addf %40, %41 : vector<8x256xf32>
    %43 = arith.negf %42 : vector<8x256xf32>
    %44 = math.exp %43 : vector<8x256xf32>
    %cst_17 = arith.constant 1.000000e+00 : f32
    %45 = vector.broadcast %cst_17 : f32 to vector<8x256xf32>
    %46 = arith.addf %45, %44 : vector<8x256xf32>
    %47 = arith.divf %45, %46 : vector<8x256xf32>
    %48 = vector.extract_strided_slice %47 {offsets = [0, 0], sizes = [8, 64], strides = [1, 1]} : vector<8x256xf32> to vector<8x64xf32>
    %49 = vector.extract_strided_slice %47 {offsets = [0, 64], sizes = [8, 64], strides = [1, 1]} : vector<8x256xf32> to vector<8x64xf32>
    %50 = vector.extract_strided_slice %42 {offsets = [0, 128], sizes = [8, 64], strides = [1, 1]} : vector<8x256xf32> to vector<8x64xf32>
    %51 = math.tanh %50 : vector<8x64xf32>
    %52 = vector.extract_strided_slice %47 {offsets = [0, 192], sizes = [8, 64], strides = [1, 1]} : vector<8x256xf32> to vector<8x64xf32>
    %53 = arith.mulf %49, %37 : vector<8x64xf32>
    %54 = arith.mulf %48, %51 : vector<8x64xf32>
    %55 = arith.addf %53, %54 : vector<8x64xf32>
    %56 = math.tanh %55 : vector<8x64xf32>
    %57 = arith.mulf %52, %56 : vector<8x64xf32>
    %c16 = arith.constant 16 : index
    %c0_18 = arith.constant 0 : index
    %58 = vector.load %arg4[%c16, %c0_18] : memref<72x256xf32, #tpu.memory_space<vmem>>, vector<8x256xf32>
    %cst_19 = arith.constant dense<0.000000e+00> : vector<8x256xf32>
    %59 = tpu.matmul %57, %0, %cst_19 {dimension_numbers = #tpu.dot_dimension_numbers<[1], [0], [0], [1], [0, 0, 1, 1], [], []>} : vector<8x64xf32>, vector<64x256xf32>, vector<8x256xf32> -> vector<8x256xf32>
    %60 = arith.addf %58, %59 : vector<8x256xf32>
    %61 = arith.negf %60 : vector<8x256xf32>
    %62 = math.exp %61 : vector<8x256xf32>
    %cst_20 = arith.constant 1.000000e+00 : f32
    %63 = vector.broadcast %cst_20 : f32 to vector<8x256xf32>
    %64 = arith.addf %63, %62 : vector<8x256xf32>
    %65 = arith.divf %63, %64 : vector<8x256xf32>
    %66 = vector.extract_strided_slice %65 {offsets = [0, 0], sizes = [8, 64], strides = [1, 1]} : vector<8x256xf32> to vector<8x64xf32>
    %67 = vector.extract_strided_slice %65 {offsets = [0, 64], sizes = [8, 64], strides = [1, 1]} : vector<8x256xf32> to vector<8x64xf32>
    %68 = vector.extract_strided_slice %60 {offsets = [0, 128], sizes = [8, 64], strides = [1, 1]} : vector<8x256xf32> to vector<8x64xf32>
    %69 = math.tanh %68 : vector<8x64xf32>
    %70 = vector.extract_strided_slice %65 {offsets = [0, 192], sizes = [8, 64], strides = [1, 1]} : vector<8x256xf32> to vector<8x64xf32>
    %71 = arith.mulf %67, %55 : vector<8x64xf32>
    %72 = arith.mulf %66, %69 : vector<8x64xf32>
    %73 = arith.addf %71, %72 : vector<8x64xf32>
    %74 = math.tanh %73 : vector<8x64xf32>
    %75 = arith.mulf %70, %74 : vector<8x64xf32>
    %c24 = arith.constant 24 : index
    %c0_21 = arith.constant 0 : index
    %76 = vector.load %arg4[%c24, %c0_21] : memref<72x256xf32, #tpu.memory_space<vmem>>, vector<8x256xf32>
    %cst_22 = arith.constant dense<0.000000e+00> : vector<8x256xf32>
    %77 = tpu.matmul %75, %0, %cst_22 {dimension_numbers = #tpu.dot_dimension_numbers<[1], [0], [0], [1], [0, 0, 1, 1], [], []>} : vector<8x64xf32>, vector<64x256xf32>, vector<8x256xf32> -> vector<8x256xf32>
    %78 = arith.addf %76, %77 : vector<8x256xf32>
    %79 = arith.negf %78 : vector<8x256xf32>
    %80 = math.exp %79 : vector<8x256xf32>
    %cst_23 = arith.constant 1.000000e+00 : f32
    %81 = vector.broadcast %cst_23 : f32 to vector<8x256xf32>
    %82 = arith.addf %81, %80 : vector<8x256xf32>
    %83 = arith.divf %81, %82 : vector<8x256xf32>
    %84 = vector.extract_strided_slice %83 {offsets = [0, 0], sizes = [8, 64], strides = [1, 1]} : vector<8x256xf32> to vector<8x64xf32>
    %85 = vector.extract_strided_slice %83 {offsets = [0, 64], sizes = [8, 64], strides = [1, 1]} : vector<8x256xf32> to vector<8x64xf32>
    %86 = vector.extract_strided_slice %78 {offsets = [0, 128], sizes = [8, 64], strides = [1, 1]} : vector<8x256xf32> to vector<8x64xf32>
    %87 = math.tanh %86 : vector<8x64xf32>
    %88 = vector.extract_strided_slice %83 {offsets = [0, 192], sizes = [8, 64], strides = [1, 1]} : vector<8x256xf32> to vector<8x64xf32>
    %89 = arith.mulf %85, %73 : vector<8x64xf32>
    %90 = arith.mulf %84, %87 : vector<8x64xf32>
    %91 = arith.addf %89, %90 : vector<8x64xf32>
    %92 = math.tanh %91 : vector<8x64xf32>
    %93 = arith.mulf %88, %92 : vector<8x64xf32>
    %c32 = arith.constant 32 : index
    %c0_24 = arith.constant 0 : index
    %94 = vector.load %arg4[%c32, %c0_24] : memref<72x256xf32, #tpu.memory_space<vmem>>, vector<8x256xf32>
    %cst_25 = arith.constant dense<0.000000e+00> : vector<8x256xf32>
    %95 = tpu.matmul %93, %0, %cst_25 {dimension_numbers = #tpu.dot_dimension_numbers<[1], [0], [0], [1], [0, 0, 1, 1], [], []>} : vector<8x64xf32>, vector<64x256xf32>, vector<8x256xf32> -> vector<8x256xf32>
    %96 = arith.addf %94, %95 : vector<8x256xf32>
    %97 = arith.negf %96 : vector<8x256xf32>
    %98 = math.exp %97 : vector<8x256xf32>
    %cst_26 = arith.constant 1.000000e+00 : f32
    %99 = vector.broadcast %cst_26 : f32 to vector<8x256xf32>
    %100 = arith.addf %99, %98 : vector<8x256xf32>
    %101 = arith.divf %99, %100 : vector<8x256xf32>
    %102 = vector.extract_strided_slice %101 {offsets = [0, 0], sizes = [8, 64], strides = [1, 1]} : vector<8x256xf32> to vector<8x64xf32>
    %103 = vector.extract_strided_slice %101 {offsets = [0, 64], sizes = [8, 64], strides = [1, 1]} : vector<8x256xf32> to vector<8x64xf32>
    %104 = vector.extract_strided_slice %96 {offsets = [0, 128], sizes = [8, 64], strides = [1, 1]} : vector<8x256xf32> to vector<8x64xf32>
    %105 = math.tanh %104 : vector<8x64xf32>
    %106 = vector.extract_strided_slice %101 {offsets = [0, 192], sizes = [8, 64], strides = [1, 1]} : vector<8x256xf32> to vector<8x64xf32>
    %107 = arith.mulf %103, %91 : vector<8x64xf32>
    %108 = arith.mulf %102, %105 : vector<8x64xf32>
    %109 = arith.addf %107, %108 : vector<8x64xf32>
    %110 = math.tanh %109 : vector<8x64xf32>
    %111 = arith.mulf %106, %110 : vector<8x64xf32>
    %c40 = arith.constant 40 : index
    %c0_27 = arith.constant 0 : index
    %112 = vector.load %arg4[%c40, %c0_27] : memref<72x256xf32, #tpu.memory_space<vmem>>, vector<8x256xf32>
    %cst_28 = arith.constant dense<0.000000e+00> : vector<8x256xf32>
    %113 = tpu.matmul %111, %0, %cst_28 {dimension_numbers = #tpu.dot_dimension_numbers<[1], [0], [0], [1], [0, 0, 1, 1], [], []>} : vector<8x64xf32>, vector<64x256xf32>, vector<8x256xf32> -> vector<8x256xf32>
    %114 = arith.addf %112, %113 : vector<8x256xf32>
    %115 = arith.negf %114 : vector<8x256xf32>
    %116 = math.exp %115 : vector<8x256xf32>
    %cst_29 = arith.constant 1.000000e+00 : f32
    %117 = vector.broadcast %cst_29 : f32 to vector<8x256xf32>
    %118 = arith.addf %117, %116 : vector<8x256xf32>
    %119 = arith.divf %117, %118 : vector<8x256xf32>
    %120 = vector.extract_strided_slice %119 {offsets = [0, 0], sizes = [8, 64], strides = [1, 1]} : vector<8x256xf32> to vector<8x64xf32>
    %121 = vector.extract_strided_slice %119 {offsets = [0, 64], sizes = [8, 64], strides = [1, 1]} : vector<8x256xf32> to vector<8x64xf32>
    %122 = vector.extract_strided_slice %114 {offsets = [0, 128], sizes = [8, 64], strides = [1, 1]} : vector<8x256xf32> to vector<8x64xf32>
    %123 = math.tanh %122 : vector<8x64xf32>
    %124 = vector.extract_strided_slice %119 {offsets = [0, 192], sizes = [8, 64], strides = [1, 1]} : vector<8x256xf32> to vector<8x64xf32>
    %125 = arith.mulf %121, %109 : vector<8x64xf32>
    %126 = arith.mulf %120, %123 : vector<8x64xf32>
    %127 = arith.addf %125, %126 : vector<8x64xf32>
    %128 = math.tanh %127 : vector<8x64xf32>
    %129 = arith.mulf %124, %128 : vector<8x64xf32>
    %c48 = arith.constant 48 : index
    %c0_30 = arith.constant 0 : index
    %130 = vector.load %arg4[%c48, %c0_30] : memref<72x256xf32, #tpu.memory_space<vmem>>, vector<8x256xf32>
    %cst_31 = arith.constant dense<0.000000e+00> : vector<8x256xf32>
    %131 = tpu.matmul %129, %0, %cst_31 {dimension_numbers = #tpu.dot_dimension_numbers<[1], [0], [0], [1], [0, 0, 1, 1], [], []>} : vector<8x64xf32>, vector<64x256xf32>, vector<8x256xf32> -> vector<8x256xf32>
    %132 = arith.addf %130, %131 : vector<8x256xf32>
    %133 = arith.negf %132 : vector<8x256xf32>
    %134 = math.exp %133 : vector<8x256xf32>
    %cst_32 = arith.constant 1.000000e+00 : f32
    %135 = vector.broadcast %cst_32 : f32 to vector<8x256xf32>
    %136 = arith.addf %135, %134 : vector<8x256xf32>
    %137 = arith.divf %135, %136 : vector<8x256xf32>
    %138 = vector.extract_strided_slice %137 {offsets = [0, 0], sizes = [8, 64], strides = [1, 1]} : vector<8x256xf32> to vector<8x64xf32>
    %139 = vector.extract_strided_slice %137 {offsets = [0, 64], sizes = [8, 64], strides = [1, 1]} : vector<8x256xf32> to vector<8x64xf32>
    %140 = vector.extract_strided_slice %132 {offsets = [0, 128], sizes = [8, 64], strides = [1, 1]} : vector<8x256xf32> to vector<8x64xf32>
    %141 = math.tanh %140 : vector<8x64xf32>
    %142 = vector.extract_strided_slice %137 {offsets = [0, 192], sizes = [8, 64], strides = [1, 1]} : vector<8x256xf32> to vector<8x64xf32>
    %143 = arith.mulf %139, %127 : vector<8x64xf32>
    %144 = arith.mulf %138, %141 : vector<8x64xf32>
    %145 = arith.addf %143, %144 : vector<8x64xf32>
    %146 = math.tanh %145 : vector<8x64xf32>
    %147 = arith.mulf %142, %146 : vector<8x64xf32>
    %c56 = arith.constant 56 : index
    %c0_33 = arith.constant 0 : index
    %148 = vector.load %arg4[%c56, %c0_33] : memref<72x256xf32, #tpu.memory_space<vmem>>, vector<8x256xf32>
    %cst_34 = arith.constant dense<0.000000e+00> : vector<8x256xf32>
    %149 = tpu.matmul %147, %0, %cst_34 {dimension_numbers = #tpu.dot_dimension_numbers<[1], [0], [0], [1], [0, 0, 1, 1], [], []>} : vector<8x64xf32>, vector<64x256xf32>, vector<8x256xf32> -> vector<8x256xf32>
    %150 = arith.addf %148, %149 : vector<8x256xf32>
    %151 = arith.negf %150 : vector<8x256xf32>
    %152 = math.exp %151 : vector<8x256xf32>
    %cst_35 = arith.constant 1.000000e+00 : f32
    %153 = vector.broadcast %cst_35 : f32 to vector<8x256xf32>
    %154 = arith.addf %153, %152 : vector<8x256xf32>
    %155 = arith.divf %153, %154 : vector<8x256xf32>
    %156 = vector.extract_strided_slice %155 {offsets = [0, 0], sizes = [8, 64], strides = [1, 1]} : vector<8x256xf32> to vector<8x64xf32>
    %157 = vector.extract_strided_slice %155 {offsets = [0, 64], sizes = [8, 64], strides = [1, 1]} : vector<8x256xf32> to vector<8x64xf32>
    %158 = vector.extract_strided_slice %150 {offsets = [0, 128], sizes = [8, 64], strides = [1, 1]} : vector<8x256xf32> to vector<8x64xf32>
    %159 = math.tanh %158 : vector<8x64xf32>
    %160 = vector.extract_strided_slice %155 {offsets = [0, 192], sizes = [8, 64], strides = [1, 1]} : vector<8x256xf32> to vector<8x64xf32>
    %161 = arith.mulf %157, %145 : vector<8x64xf32>
    %162 = arith.mulf %156, %159 : vector<8x64xf32>
    %163 = arith.addf %161, %162 : vector<8x64xf32>
    %164 = math.tanh %163 : vector<8x64xf32>
    %165 = arith.mulf %160, %164 : vector<8x64xf32>
    %c64_36 = arith.constant 64 : index
    %c0_37 = arith.constant 0 : index
    %166 = vector.load %arg4[%c64_36, %c0_37] : memref<72x256xf32, #tpu.memory_space<vmem>>, vector<8x256xf32>
    %cst_38 = arith.constant dense<0.000000e+00> : vector<8x256xf32>
    %167 = tpu.matmul %165, %0, %cst_38 {dimension_numbers = #tpu.dot_dimension_numbers<[1], [0], [0], [1], [0, 0, 1, 1], [], []>} : vector<8x64xf32>, vector<64x256xf32>, vector<8x256xf32> -> vector<8x256xf32>
    %168 = arith.addf %166, %167 : vector<8x256xf32>
    %169 = arith.negf %168 : vector<8x256xf32>
    %170 = math.exp %169 : vector<8x256xf32>
    %cst_39 = arith.constant 1.000000e+00 : f32
    %171 = vector.broadcast %cst_39 : f32 to vector<8x256xf32>
    %172 = arith.addf %171, %170 : vector<8x256xf32>
    %173 = arith.divf %171, %172 : vector<8x256xf32>
    %174 = vector.extract_strided_slice %173 {offsets = [0, 0], sizes = [8, 64], strides = [1, 1]} : vector<8x256xf32> to vector<8x64xf32>
    %175 = vector.extract_strided_slice %173 {offsets = [0, 64], sizes = [8, 64], strides = [1, 1]} : vector<8x256xf32> to vector<8x64xf32>
    %176 = vector.extract_strided_slice %168 {offsets = [0, 128], sizes = [8, 64], strides = [1, 1]} : vector<8x256xf32> to vector<8x64xf32>
    %177 = math.tanh %176 : vector<8x64xf32>
    %178 = vector.extract_strided_slice %173 {offsets = [0, 192], sizes = [8, 64], strides = [1, 1]} : vector<8x256xf32> to vector<8x64xf32>
    %179 = arith.mulf %175, %163 : vector<8x64xf32>
    %180 = arith.mulf %174, %177 : vector<8x64xf32>
    %181 = arith.addf %179, %180 : vector<8x64xf32>
    %182 = math.tanh %181 : vector<8x64xf32>
    %183 = arith.mulf %178, %182 : vector<8x64xf32>
    %184 = vector.extract_strided_slice %183 {offsets = [0, 32], sizes = [8, 32], strides = [1, 1]} : vector<8x64xf32> to vector<8x32xf32>
    %185 = vector.extract_strided_slice %3 {offsets = [0, 0], sizes = [1, 32], strides = [1, 1]} : vector<1x256xf32> to vector<1x32xf32>
    %186 = vector.extract_strided_slice %3 {offsets = [0, 32], sizes = [1, 1], strides = [1, 1]} : vector<1x256xf32> to vector<1x1xf32>
    %187 = vector.broadcast %185 : vector<1x32xf32> to vector<8x32xf32>
    %188 = arith.mulf %184, %187 : vector<8x32xf32>
    %cst_40 = arith.constant dense<0.000000e+00> : vector<8xf32>
    %189 = vector.multi_reduction <add>, %188, %cst_40 [1] : vector<8x32xf32> to vector<8xf32>
    %190 = vector.shape_cast %189 : vector<8xf32> to vector<8x1xf32>
    %191 = vector.broadcast %186 : vector<1x1xf32> to vector<8x1xf32>
    %192 = arith.addf %190, %191 : vector<8x1xf32>
    %193 = arith.negf %192 : vector<8x1xf32>
    %194 = math.exp %193 : vector<8x1xf32>
    %cst_41 = arith.constant 1.000000e+00 : f32
    %195 = vector.broadcast %cst_41 : f32 to vector<8x1xf32>
    %196 = arith.addf %195, %194 : vector<8x1xf32>
    %197 = arith.divf %195, %196 : vector<8x1xf32>
    %c0_42 = arith.constant 0 : index
    %c0_43 = arith.constant 0 : index
    %198 = vector.load %arg3[%c0_42, %c0_43] : memref<8x1xf32, #tpu.memory_space<vmem>>, vector<8x1xf32>
    tpu.vector_store %arg3[%c0_42, %c0_43], %197 {strides = array<i32>} : memref<8x1xf32, #tpu.memory_space<vmem>>, vector<8x1xf32>,
    return
  }
}

</mosaic_0001>

<bundles_post_ra>
// kernel: lstm_net_forward.1
= control target key start
LH: loop header
LB: loop body
LE: loop exit
PB: predicated region body
PF: predicated region fallthrough
CT: control target
= control target key end

     0   :  { %v1552_v0 = vmov 0   ;;  %v1553_v5 = vmov 0.0   ;;  %vm1554_vm0 = vmmov 0   ;;  %v47_v30 = vlaneseq  ;;  %s1556_s14 = smov 64   ;;  %s1557_s22 = smov 96   ;;  %s2060_s0 = inlined_call_operand.vmem [shape: s32[72,1], index: 0, kind: input, shape index: {}]   ;;  %s2061_s1 = inlined_call_operand.vmem [shape: f32[128,16], index: 1, kind: input, shape index: {}]   ;;  %s2062_s2 = inlined_call_operand.vmem [shape: f32[82,256], index: 2, kind: input, shape index: {}]   ;;  %s2063_s3 = inlined_call_operand.vmem [shape: f32[8,1], index: 3, kind: output, shape index: {}]  }
   0x1   :  { %1438 = vset.pattern.permute.xlu0 %v1552_v0  ;;  %v38_v1 = vld [vmem:[%s2060_s0] sm:$0xff]  ;;  %1439 = vset.pattern.permute.xlu1 %v1552_v0  ;;  %v40_v2 = vld [vmem:[%s2060_s0 + $0x10] sm:$0xff]  ;;  %v39_v3 = vld [vmem:[%s2060_s0 + $0x8] sm:$0xff]  ;;  %v1555_v33 = vmov 1.0   ;;  %vm240_vm11 = vcmask 130048   ;;  %vm443_vm12 = vcmask 523264  }
   0x2   :  { %50 = vperm.xlu0 %1438, %v38_v1   ;;  %56 = vperm.xlu1 %1439, %v40_v2   ;;  %v41_v4 = vld [vmem:[%s2060_s0 + $0x18] sm:$0xff]  ;;  %v117_v7 = vld [vmem:[%s2061_s1 + $0x70] sm:$0xff]  ;;  %v42_v8 = vld [vmem:[%s2060_s0 + $0x20] sm:$0xff]  ;;  %v48_v31 = vand.u32 127, %v47_v30  ;;  %v1727_v62 = vshrl.u32 %v47_v30, 7  ;;  %vm1268_vm13 = vcmask 261120  }
   0x3   :  { %1372 = vmatprep.subr.mxu0 %v1553_v5  ;;  %1404 = vmatprep.mubr.msk.f32.mxu0 %vm1554_vm0, %v1553_v5  ;;  %v118_v6 = vld [vmem:[%s2061_s1 + $0x78] sm:$0xff]  ;;  %v43_v9 = vld [vmem:[%s2060_s0 + $0x28] sm:$0xff]  ;;  %v115_v11 = vld [vmem:[%s2061_s1 + $0x60] sm:$0xff]  ;;  %vm1284_vm14 = vcmask 7168  }
   0x4   :  { %332 = vmatprep.mubr.f32.mxu1 %v1553_v5  ;;  %1373 = vmatpush3.msra.mxu0 %v118_v6  ;;  %v116_v10 = vld [vmem:[%s2061_s1 + $0x68] sm:$0xff]  ;;  %v44_v12 = vld [vmem:[%s2060_s0 + $0x30] sm:$0xff]  ;;  %v45_v13 = vld [vmem:[%s2060_s0 + $0x38] sm:$0xff]  ;;  %vm405_vm10 = vcmp.lt.s32.totalorder %v48_v31, 32  ;;  %v232_v63 = vsub.s32 0, %v1727_v62 }
   0x5   :  { %1374 = vmatprep.subr.mxu0 %v1553_v5  ;;  %v114_v14 = vld [vmem:[%s2061_s1 + $0x58] sm:$0xff]  ;;  %v46_v15 = vld [vmem:[%s2060_s0 + $0x40] sm:$0xff]  ;;  %v113_v16 = vld [vmem:[%s2061_s1 + $0x50] sm:$0xff]  ;;  %v1704_v43 = vsel %vm405_vm10, 1.0, %v1553_v5 }
   0x6   :  { %53 = vperm.xlu0 %1438, %v39_v3   ;;  %59 = vperm.xlu1 %1439, %v41_v4   ;;  %v112_v17 = vld [vmem:[%s2061_s1 + $0x48] sm:$0xff]  ;;  %v111_v18 = vld [vmem:[%s2061_s1 + $0x40] sm:$0xff]  ;;  %v110_v19 = vld [vmem:[%s2061_s1 + $0x38] sm:$0xff] }
   0x7   :  { %1375 = vmatpush3.msra.mxu0 %v117_v7  ;;  %v109_v20 = vld [vmem:[%s2061_s1 + $0x30] sm:$0xff]  ;;  %v108_v21 = vld [vmem:[%s2061_s1 + $0x28] sm:$0xff]  ;;  %v107_v22 = vld [vmem:[%s2061_s1 + $0x20] sm:$0xff] }
   0x8   :  { %1376 = vmatprep.subr.mxu0 %v1553_v5  ;;  %v106_v23 = vld [vmem:[%s2061_s1 + $0x18] sm:$0xff]  ;;  %v105_v24 = vld [vmem:[%s2061_s1 + $0x10] sm:$0xff]  ;;  %v31_v27 = vld [vmem:[%s2062_s2 + $0x88] sm:$0xff] }
   0x9   :  { %1377 = vmatpush3.msra.mxu0 %v116_v10  ;;  %v33_v25 = vld [vmem:[%s2062_s2 + $0x98] sm:$0xff]  ;;  %v32_v26 = vld [vmem:[%s2062_s2 + $0x90] sm:$0xff]  ;;  %v104_v28 = vld [vmem:[%s2061_s1 + $0x8] sm:$0xff] }
   0xa   :  { %62 = vperm.xlu0 %1438, %v42_v8   ;;  %65 = vperm.xlu1 %1439, %v43_v9   ;;  %v103_v29 = vld [vmem:[%s2061_s1] sm:$0xff]  ;;  %v236_v8 = vsub.s32 1, %v1727_v62 }
   0xb   :  { %1378 = vmatprep.subr.mxu0 %v1553_v5  ;;  %296 = vmatprep.subr.mxu1 %v33_v25  ;;  %v30_v42 = vld [vmem:[%s2062_s2 + $0x80] sm:$0xff] }
   0xc   :  { %1379 = vmatpush3.msra.mxu0 %v115_v11  ;;  %297 = vmatpush1.msra.mxu1 %v32_v26  ;;  %v1290_v0 = vld [vmem:[%s2062_s2 + $0xa0] ss:$8 sm:$0x3] }
   0xd   :  { %1380 = vmatprep.subr.mxu0 %v1553_v5  ;;  %298 = vmatprep.subr.mxu1 %v31_v27  ;;  %v1735_v1 = vrot.slane %v1290_v0, %v232_v63  ;;  %v1743_v11 = vrot.slane %v1290_v0, %v236_v8 }
   0xe   :  { %68 = vperm.xlu0 %1438, %v44_v12   ;;  %71 = vperm.xlu1 %1439, %v45_v13  }
   0xf   :  { %1381 = vmatpush3.msra.mxu0 %v114_v14  ;;  %299 = vmatpush1.msra.mxu1 %v30_v42 }
  0x10   :  { %1382 = vmatprep.subr.mxu0 %v1553_v5 }
  0x11   :  { %1383 = vmatpush3.msra.mxu0 %v113_v16 }
  0x12   :  { %74 = vperm.xlu0 %1438, %v46_v15   ;;  %1384 = vmatprep.subr.mxu0 %v1553_v5 }
  0x13   :  { %1385 = vmatpush3.msra.mxu0 %v112_v17 }
  0x14   :  { %1386 = vmatprep.subr.mxu0 %v1553_v5 }
  0x15   :  { %1387 = vmatpush3.msra.mxu0 %v111_v18 }
  0x16   :  { %1388 = vmatprep.subr.mxu0 %v1553_v5  ;;  %425 = vrot.lane.b32.xlu0 %v1704_v43, %s1556_s14 }
  0x17   :  { %1389 = vmatpush3.msra.mxu0 %v110_v19 }
  0x18   :  { %1390 = vmatprep.subr.mxu0 %v1553_v5 }
  0x19   :  { %1391 = vmatpush3.msra.mxu0 %v109_v20 }
  0x1a   :  { %1392 = vmatprep.subr.mxu0 %v1553_v5 }
  0x1b   :  { %1393 = vmatpush3.msra.mxu0 %v108_v21 }
  0x1c   :  { %1394 = vmatprep.subr.mxu0 %v1553_v5 }
  0x1d   :  { %1395 = vmatpush3.msra.mxu0 %v107_v22 }
  0x1e   :  { %1396 = vmatprep.subr.mxu0 %v1553_v5 }
  0x1f   :  { %1397 = vmatpush3.msra.mxu0 %v106_v23 }
  0x20   :  { %1398 = vmatprep.subr.mxu0 %v1553_v5 }
  0x21   :  { %1399 = vmatpush3.msra.mxu0 %v105_v24 }
  0x22   :  { %1400 = vmatprep.subr.mxu0 %v1553_v5 }
  0x23   :  { %1401 = vmatpush3.msra.mxu0 %v104_v28 }
  0x24   :  { %1402 = vmatprep.subr.mxu0 %v1553_v5 }
  0x25   :  { %1403 = vmatpush3.msra.mxu0 %v103_v29 }
  0x7d   :  { %v51_v32 = vpop.permute.xlu0 %50  ;;  %v57_v34 = vpop.permute.xlu1 %56 }
  0x7e   :  { %vm76_vm1 = vcmp.eq.s32.totalorder %v48_v31, %v51_v32  ;;  %vm78_vm3 = vcmp.eq.s32.totalorder %v48_v31, %v57_v34 }
  0x7f   :  { %1405 = vmatmul.mubr.msk.f32.vlgmr.msra.gmra.mxu0 %vm76_vm1, %v1555_v33 }
  0x80   :  { %1407 = vmatprep.mubr.msk.f32.mxu0 %vm1554_vm0, %v1553_v5 }
  0x81   :  { %v54_v35 = vpop.permute.xlu0 %53  ;;  %v60_v36 = vpop.permute.xlu1 %59 }
  0x82   :  { %vm77_vm2 = vcmp.eq.s32.totalorder %v48_v31, %v54_v35  ;;  %vm79_vm4 = vcmp.eq.s32.totalorder %v48_v31, %v60_v36 }
  0x83   :  { %1408 = vmatmul.mubr.msk.f32.gmra.mxu0 %vm77_vm2, %v1555_v33 }
  0x84   :  { %1410 = vmatprep.mubr.msk.f32.mxu0 %vm1554_vm0, %v1553_v5 }
  0x85   :  { %v63_v37 = vpop.permute.xlu0 %62  ;;  %v66_v38 = vpop.permute.xlu1 %65 }
  0x86   :  { %vm80_vm5 = vcmp.eq.s32.totalorder %v48_v31, %v63_v37  ;;  %vm81_vm6 = vcmp.eq.s32.totalorder %v48_v31, %v66_v38 }
  0x87   :  { %1411 = vmatmul.mubr.msk.f32.gmra.mxu0 %vm78_vm3, %v1555_v33 }
  0x88   :  { %1413 = vmatprep.mubr.msk.f32.mxu0 %vm1554_vm0, %v1553_v5 }
  0x89   :  { %v69_v39 = vpop.permute.xlu0 %68  ;;  %v72_v40 = vpop.permute.xlu1 %71 }
  0x8a   :  { %vm82_vm7 = vcmp.eq.s32.totalorder %v48_v31, %v69_v39  ;;  %vm83_vm8 = vcmp.eq.s32.totalorder %v48_v31, %v72_v40 }
  0x8b   :  { %1414 = vmatmul.mubr.msk.f32.gmra.mxu0 %vm79_vm4, %v1555_v33 }
  0x8c   :  { %1416 = vmatprep.mubr.msk.f32.mxu0 %vm1554_vm0, %v1553_v5 }
  0x8d   :  { %v75_v41 = vpop.permute.xlu0 %74 }
  0x8e   :  { %vm84_vm9 = vcmp.eq.s32.totalorder %v48_v31, %v75_v41 }
  0x8f   :  { %1417 = vmatmul.mubr.msk.f32.gmra.mxu0 %vm80_vm5, %v1555_v33 }
  0x90   :  { %1419 = vmatprep.mubr.msk.f32.mxu0 %vm1554_vm0, %v1553_v5 }
  0x91   :  { %v426_v8 = vpop.permute.xlu0 %425 }
  0x93   :  { %1420 = vmatmul.mubr.msk.f32.gmra.mxu0 %vm81_vm6, %v1555_v33 }
  0x94   :  { %1422 = vmatprep.mubr.msk.f32.mxu0 %vm1554_vm0, %v1553_v5 }
  0x97   :  { %1423 = vmatmul.mubr.msk.f32.gmra.mxu0 %vm82_vm7, %v1555_v33 }
  0x98   :  { %1425 = vmatprep.mubr.msk.f32.mxu0 %vm1554_vm0, %v1553_v5 }
  0x9b   :  { %1426 = vmatmul.mubr.msk.f32.gmra.mxu0 %vm83_vm8, %v1555_v33 }
  0x9c   :  { %1428 = vmatprep.mubr.msk.f32.mxu0 %vm1554_vm0, %v1553_v5 }
  0x9f   :  { %1429 = vmatmul.mubr.msk.f32.gmra.mxu0 %vm84_vm9, %v1555_v33 }
  0xa0   :  { %714 = vmatprep.mubr.f32.mxu0 %v1553_v5 }
 0x13f   :  { %v185_v44 = vpop.f32.mrf.mxu0 }
 0x140   :  { %1310 = vmatmul.mubr.msk.f32.vlgmr.msra.gmra.mxu1 %vm240_vm11, %v185_v44 }
 0x141   :  { %v1406_v45 = vpop.f32.mrf.mxu0  ;;  %338 = vmatprep.mubr.f32.mxu1 %v1553_v5 }
 0x142   :  { %v1793_v45 = vld [vmem:[%s2062_s2 + $0x78] sm:$0xff] }
 0x143   :  { %v190_v46 = vpop.f32.mrf.mxu0  ;;  %462 = vmatprep.subr.mxu1 %v1793_v45  ;;  %666 = vmatprep.subr.mxu0 %v1793_v45 }
 0x144   :  { %1311 = vmatmul.mubr.msk.f32.gmra.mxu1 %vm240_vm11, %v190_v46  ;;  %v1798_v46 = vld [vmem:[%s2062_s2 + $0x70] sm:$0xff] }
 0x145   :  { %v1409_v47 = vpop.f32.mrf.mxu0  ;;  %344 = vmatprep.mubr.f32.mxu1 %v1553_v5  ;;  %463 = vmatpush1.msra.mxu1 %v1798_v46 }
 0x146   :  { %v1803_v47 = vld [vmem:[%s2062_s2 + $0x68] sm:$0xff]  ;;  %667 = vmatpush1.msra.mxu0 %v1798_v46 }
 0x147   :  { %v195_v48 = vpop.f32.mrf.mxu0  ;;  %464 = vmatprep.subr.mxu1 %v1803_v47  ;;  %668 = vmatprep.subr.mxu0 %v1803_v47 }
 0x148   :  { %1312 = vmatmul.mubr.msk.f32.gmra.mxu1 %vm240_vm11, %v195_v48  ;;  %v1816_v48 = vld [vmem:[%s2062_s2 + $0x58] sm:$0xff] }
 0x149   :  { %v1412_v49 = vpop.f32.mrf.mxu0  ;;  %350 = vmatprep.mubr.f32.mxu1 %v1553_v5 }
 0x14a   :  { %v1823_v49 = vld [vmem:[%s2062_s2 + $0x50] sm:$0xff] }
 0x14b   :  { %v200_v50 = vpop.f32.mrf.mxu0 }
 0x14c   :  { %1313 = vmatmul.mubr.msk.f32.gmra.mxu1 %vm240_vm11, %v200_v50  ;;  %v1830_v50 = vld [vmem:[%s2062_s2 + $0x48] sm:$0xff] }
 0x14d   :  { %v1415_v51 = vpop.f32.mrf.mxu0  ;;  %356 = vmatprep.mubr.f32.mxu1 %v1553_v5 }
 0x14e   :  { %v1837_v51 = vld [vmem:[%s2062_s2 + $0x40] sm:$0xff] }
 0x14f   :  { %v205_v52 = vpop.f32.mrf.mxu0 }
 0x150   :  { %1314 = vmatmul.mubr.msk.f32.gmra.mxu1 %vm240_vm11, %v205_v52  ;;  %v1844_v52 = vld [vmem:[%s2062_s2 + $0x38] sm:$0xff] }
 0x151   :  { %v1418_v53 = vpop.f32.mrf.mxu0  ;;  %362 = vmatprep.mubr.f32.mxu1 %v1553_v5 }
 0x152   :  { %v1851_v53 = vld [vmem:[%s2062_s2 + $0x30] sm:$0xff] }
 0x153   :  { %v210_v54 = vpop.f32.mrf.mxu0 }
 0x154   :  { %1315 = vmatmul.mubr.msk.f32.gmra.mxu1 %vm240_vm11, %v210_v54  ;;  %v1858_v54 = vld [vmem:[%s2062_s2 + $0x28] sm:$0xff] }
 0x155   :  { %v1421_v55 = vpop.f32.mrf.mxu0  ;;  %368 = vmatprep.mubr.f32.mxu1 %v1553_v5 }
 0x156   :  { %v1865_v55 = vld [vmem:[%s2062_s2 + $0x20] sm:$0xff] }
 0x157   :  { %v215_v56 = vpop.f32.mrf.mxu0 }
 0x158   :  { %1316 = vmatmul.mubr.msk.f32.gmra.mxu1 %vm240_vm11, %v215_v56  ;;  %v1872_v56 = vld [vmem:[%s2062_s2 + $0x18] sm:$0xff] }
 0x159   :  { %v1424_v57 = vpop.f32.mrf.mxu0  ;;  %374 = vmatprep.mubr.f32.mxu1 %v1553_v5 }
 0x15a   :  { %v1879_v57 = vld [vmem:[%s2062_s2 + $0x10] sm:$0xff] }
 0x15b   :  { %v220_v58 = vpop.f32.mrf.mxu0 }
 0x15c   :  { %1317 = vmatmul.mubr.msk.f32.gmra.mxu1 %vm240_vm11, %v220_v58  ;;  %v1886_v58 = vld [vmem:[%s2062_s2 + $0x8] sm:$0xff] }
 0x15d   :  { %v1427_v59 = vpop.f32.mrf.mxu0  ;;  %380 = vmatprep.mubr.f32.mxu1 %v1553_v5 }
 0x15e   :  { %v1893_v59 = vld [vmem:[%s2062_s2] sm:$0xff] }
 0x15f   :  { %v225_v60 = vpop.f32.mrf.mxu0 }
 0x160   :  { %1318 = vmatmul.mubr.msk.f32.gmra.mxu1 %vm240_vm11, %v225_v60 }
 0x161   :  { %v1430_v61 = vpop.f32.mrf.mxu0  ;;  %510 = vmatprep.mubr.f32.mxu1 %v1553_v5 }
 0x200   :  { %v334_v2 = vpop.f32.mrf.mxu1 }
 0x201   :  { %v335_v3 = vadd.f32 %v334_v2, %v1735_v1 }
 0x202   :  { %v336_v4 = vpop.f32.mrf.mxu1 }
 0x203   :  { %v1320_v6 = vmul.f32 -1.442695, %v335_v3  ;;  %v1761_v24 = vadd.f32 %v336_v4, %v1743_v11 }
 0x204   :  { %v1738_v7 = vpop.f32.mrf.mxu1 }
 0x205   :  { %1440 = vpow2.f32 %v1320_v6  ;;  %v1321_v60 = vmul.f32 -1.442695, %v1761_v24 }
 0x206   :  { %v1741_v9 = vpop.f32.mrf.mxu1 }
 0x208   :  { %v346_v10 = vpop.f32.mrf.mxu1 }
 0x209   :  { %v1746_v12 = vadd.f32 %v346_v10, %v1735_v1 }
 0x20a   :  { %v348_v13 = vpop.f32.mrf.mxu1 }
 0x20b   :  { %v1749_v14 = vadd.f32 %v348_v13, %v1743_v11 }
 0x20c   :  { %v352_v15 = vpop.f32.mrf.mxu1 }
 0x20d   :  { %v1752_v16 = vadd.f32 %v352_v15, %v1735_v1 }
 0x20e   :  { %v354_v17 = vpop.f32.mrf.mxu1 }
 0x20f   :  { %v1755_v18 = vadd.f32 %v354_v17, %v1743_v11 }
 0x210   :  { %v358_v19 = vpop.f32.mrf.mxu1 }
 0x211   :  { %v1758_v20 = vadd.f32 %v358_v19, %v1735_v1 }
 0x212   :  { %v1441_v21 = vpop.eup %1440  ;;  %v360_v22 = vpop.f32.mrf.mxu1 }
 0x213   :  { %v416_v23 = vadd.f32 1.0, %v1441_v21  ;;  %v1764_v25 = vadd.f32 %v360_v22, %v1743_v11  ;;  %v341_v21 = vadd.f32 %v1738_v7, %v1735_v1 }
 0x214   :  { %v364_v26 = vpop.f32.mrf.mxu1 }
 0x215   :  { %1442 = vrcp.f32 %v416_v23  ;;  %v1767_v27 = vadd.f32 %v364_v26, %v1735_v1 }
 0x216   :  { %v366_v28 = vpop.f32.mrf.mxu1  ;;  %1444 = vtanh.f32 %v1761_v24 }
 0x217   :  { %v1771_v29 = vadd.f32 %v366_v28, %v1743_v11  ;;  %1446 = vpow2.f32 %v1321_v60  ;;  %v343_v28 = vadd.f32 %v1741_v9, %v1743_v11 }
 0x218   :  { %v370_v30 = vpop.f32.mrf.mxu1 }
 0x219   :  { %v1774_v31 = vadd.f32 %v370_v30, %v1735_v1 }
 0x21a   :  { %v372_v32 = vpop.f32.mrf.mxu1 }
 0x21b   :  { %v1777_v33 = vadd.f32 %v372_v32, %v1743_v11 }
 0x21c   :  { %v376_v34 = vpop.f32.mrf.mxu1 }
 0x21d   :  { %v1780_v35 = vadd.f32 %v376_v34, %v1735_v1 }
 0x21e   :  { %v378_v36 = vpop.f32.mrf.mxu1 }
 0x21f   :  { %v1783_v37 = vadd.f32 %v378_v36, %v1743_v11 }
 0x220   :  { %v382_v38 = vpop.f32.mrf.mxu1 }
 0x221   :  { %v1786_v39 = vadd.f32 %v382_v38, %v1735_v1 }
 0x222   :  { %v1443_v40 = vpop.eup %1442  ;;  %v1924_v19 = vpop.f32.mrf.mxu1 }
 0x223   :  { %v423_v41 = vmul.f32 %v1443_v40, %v1704_v43  ;;  %v1445_v42 = vpop.eup %1444  ;;  %v1809_v43 = vld [vmem:[%s2062_s2 + $0x60] sm:$0xff]  ;;  %v429_v2 = vmul.f32 0.0, %v1443_v40 }
 0x224   :  { %465 = vmatpush1.msra.mxu1 %v1809_v43  ;;  %669 = vmatpush1.msra.mxu0 %v1809_v43  ;;  %v1447_v61 = vpop.eup %1446 }
 0x225   :  { %v430_v44 = vmul.f32 %v1445_v42, %v423_v41  ;;  %466 = vmatprep.subr.mxu1 %v1816_v48  ;;  %670 = vmatprep.subr.mxu0 %v1816_v48  ;;  %v417_v0 = vadd.f32 1.0, %v1447_v61 }
 0x226   :  { %467 = vmatpush1.msra.mxu1 %v1823_v49  ;;  %671 = vmatpush1.msra.mxu0 %v1823_v49 }
 0x227   :  { %432 = vrot.lane.b32.xlu1 %v430_v44, %s1556_s14  ;;  %468 = vmatprep.subr.mxu1 %v1830_v50  ;;  %1448 = vrcp.f32 %v417_v0 }
 0x228   :  { %672 = vmatprep.subr.mxu0 %v1830_v50  ;;  %469 = vmatpush1.msra.mxu1 %v1837_v51 }
 0x229   :  { %673 = vmatpush1.msra.mxu0 %v1837_v51  ;;  %470 = vmatprep.subr.mxu1 %v1844_v52 }
 0x22a   :  { %674 = vmatprep.subr.mxu0 %v1844_v52  ;;  %471 = vmatpush1.msra.mxu1 %v1851_v53 }
 0x22b   :  { %675 = vmatpush1.msra.mxu0 %v1851_v53  ;;  %472 = vmatprep.subr.mxu1 %v1858_v54 }
 0x22c   :  { %676 = vmatprep.subr.mxu0 %v1858_v54  ;;  %473 = vmatpush1.msra.mxu1 %v1865_v55 }
 0x22d   :  { %677 = vmatpush1.msra.mxu0 %v1865_v55  ;;  %474 = vmatprep.subr.mxu1 %v1872_v56 }
 0x22e   :  { %678 = vmatprep.subr.mxu0 %v1872_v56  ;;  %475 = vmatpush1.msra.mxu1 %v1879_v57 }
 0x22f   :  { %679 = vmatpush1.msra.mxu0 %v1879_v57  ;;  %476 = vmatprep.subr.mxu1 %v1886_v58 }
 0x230   :  { %680 = vmatprep.subr.mxu0 %v1886_v58  ;;  %477 = vmatpush1.msra.mxu1 %v1893_v59 }
 0x231   :  { %681 = vmatpush1.msra.mxu0 %v1893_v59  ;;  %564 = vmatprep.subr.mxu1 %v1793_v45 }
 0x232   :  { %870 = vmatprep.subr.mxu0 %v1793_v45 }
 0x234   :  { %v1449_v6 = vpop.eup %1448 }
 0x235   :  { %v428_v10 = vmul.f32 %v1449_v6, %v426_v8 }
 0x299   :  { %v433_v3 = vpop.permute.xlu1 %432 }
 0x29a   :  { %v435_v4 = vadd.f32 %v433_v3, %v429_v2 }
 0x29c   :  { %1450 = vtanh.f32 %v435_v4 }
 0x2a9   :  { %v1451_v13 = vpop.eup %1450 }
 0x2aa   :  { %v437_v15 = vmul.f32 %v1451_v13, %v428_v10 }
 0x2ac   :  { %441 = vrot.lane.b32.xlu1 %v437_v15, %s1556_s14 }
 0x31e   :  { %v442_v17 = vpop.permute.xlu1 %441 }
 0x31f   :  { %1322 = vmatmul.mubr.msk.f32.vlgmr.msra.gmra.mxu1 %vm443_vm12, %v442_v17 }
 0x320   :  { %565 = vmatpush1.msra.mxu1 %v1798_v46  ;;  %612 = vmatprep.mubr.f32.mxu1 %v1553_v5 }
 0x321   :  { %566 = vmatprep.subr.mxu1 %v1803_v47 }
 0x322   :  { %567 = vmatpush1.msra.mxu1 %v1809_v43 }
 0x323   :  { %568 = vmatprep.subr.mxu1 %v1816_v48 }
 0x324   :  { %569 = vmatpush1.msra.mxu1 %v1823_v49 }
 0x325   :  { %570 = vmatprep.subr.mxu1 %v1830_v50 }
 0x326   :  { %571 = vmatpush1.msra.mxu1 %v1837_v51 }
 0x327   :  { %572 = vmatprep.subr.mxu1 %v1844_v52 }
 0x328   :  { %573 = vmatpush1.msra.mxu1 %v1851_v53 }
 0x329   :  { %574 = vmatprep.subr.mxu1 %v1858_v54 }
 0x32a   :  { %575 = vmatpush1.msra.mxu1 %v1865_v55 }
 0x32b   :  { %576 = vmatprep.subr.mxu1 %v1872_v56 }
 0x32c   :  { %577 = vmatpush1.msra.mxu1 %v1879_v57 }
 0x32d   :  { %578 = vmatprep.subr.mxu1 %v1886_v58 }
 0x32e   :  { %579 = vmatpush1.msra.mxu1 %v1893_v59 }
 0x32f   :  { %768 = vmatprep.subr.mxu1 %v1793_v45 }
 0x3df   :  { %v512_v22 = vpop.f32.mrf.mxu1 }
 0x3e0   :  { %v517_v23 = vadd.f32 %v512_v22, %v341_v21 }
 0x3e1   :  { %v514_v26 = vpop.f32.mrf.mxu1 }
 0x3e2   :  { %v1323_v24 = vmul.f32 -1.442695, %v517_v23  ;;  %v518_v30 = vadd.f32 %v514_v26, %v343_v28 }
 0x3e4   :  { %1452 = vpow2.f32 %v1323_v24  ;;  %v1324_v41 = vmul.f32 -1.442695, %v518_v30 }
 0x3e5   :  { %1454 = vtanh.f32 %v518_v30 }
 0x3f1   :  { %v1453_v32 = vpop.eup %1452 }
 0x3f2   :  { %v525_v34 = vadd.f32 1.0, %v1453_v32  ;;  %v1455_v36 = vpop.eup %1454 }
 0x3f4   :  { %1456 = vrcp.f32 %v525_v34 }
 0x3f5   :  { %1458 = vpow2.f32 %v1324_v41 }
 0x401   :  { %v1457_v38 = vpop.eup %1456 }
 0x402   :  { %v533_v40 = vmul.f32 %v1457_v38, %v1455_v36  ;;  %v1459_v1 = vpop.eup %1458  ;;  %v532_v42 = vmul.f32 %v1457_v38, %v435_v4 }
 0x403   :  { %v526_v7 = vadd.f32 1.0, %v1459_v1 }
 0x404   :  { %535 = vrot.lane.b32.xlu0 %v533_v40, %s1556_s14 }
 0x405   :  { %1460 = vrcp.f32 %v526_v7 }
 0x412   :  { %v1461_v9 = vpop.eup %1460 }
 0x476   :  { %v536_v44 = vpop.permute.xlu0 %535 }
 0x477   :  { %v538_v60 = vadd.f32 %v536_v44, %v532_v42 }
 0x479   :  { %1462 = vtanh.f32 %v538_v60 }
 0x486   :  { %v1463_v61 = vpop.eup %1462 }
 0x487   :  { %v540_v0 = vmul.f32 %v1463_v61, %v1461_v9 }
 0x489   :  { %544 = vrot.lane.b32.xlu1 %v540_v0, %s1556_s14 }
 0x4fb   :  { %v545_v2 = vpop.permute.xlu1 %544 }
 0x4fc   :  { %1325 = vmatmul.mubr.msk.f32.vlgmr.msra.gmra.mxu1 %vm443_vm12, %v545_v2 }
 0x4fd   :  { %769 = vmatpush1.msra.mxu1 %v1798_v46  ;;  %816 = vmatprep.mubr.f32.mxu1 %v1553_v5 }
 0x4fe   :  { %770 = vmatprep.subr.mxu1 %v1803_v47 }
 0x4ff   :  { %771 = vmatpush1.msra.mxu1 %v1809_v43 }
 0x500   :  { %772 = vmatprep.subr.mxu1 %v1816_v48 }
 0x501   :  { %773 = vmatpush1.msra.mxu1 %v1823_v49 }
 0x502   :  { %774 = vmatprep.subr.mxu1 %v1830_v50 }
 0x503   :  { %775 = vmatpush1.msra.mxu1 %v1837_v51 }
 0x504   :  { %776 = vmatprep.subr.mxu1 %v1844_v52 }
 0x505   :  { %777 = vmatpush1.msra.mxu1 %v1851_v53 }
 0x506   :  { %778 = vmatprep.subr.mxu1 %v1858_v54 }
 0x507   :  { %779 = vmatpush1.msra.mxu1 %v1865_v55 }
 0x508   :  { %780 = vmatprep.subr.mxu1 %v1872_v56 }
 0x509   :  { %781 = vmatpush1.msra.mxu1 %v1879_v57 }
 0x50a   :  { %782 = vmatprep.subr.mxu1 %v1886_v58 }
 0x50b   :  { %783 = vmatpush1.msra.mxu1 %v1893_v59 }
 0x50c   :  { %972 = vmatprep.subr.mxu1 %v1793_v45 }
 0x5bc   :  { %v614_v3 = vpop.f32.mrf.mxu1 }
 0x5bd   :  { %v619_v4 = vadd.f32 %v614_v3, %v1746_v12 }
 0x5be   :  { %v616_v8 = vpop.f32.mrf.mxu1 }
 0x5bf   :  { %v1326_v6 = vmul.f32 -1.442695, %v619_v4  ;;  %v620_v10 = vadd.f32 %v616_v8, %v1749_v14 }
 0x5c1   :  { %1464 = vpow2.f32 %v1326_v6  ;;  %v1327_v23 = vmul.f32 -1.442695, %v620_v10 }
 0x5c2   :  { %1466 = vtanh.f32 %v620_v10 }
 0x5ce   :  { %v1465_v13 = vpop.eup %1464 }
 0x5cf   :  { %v627_v15 = vadd.f32 1.0, %v1465_v13  ;;  %v1467_v17 = vpop.eup %1466 }
 0x5d1   :  { %1468 = vrcp.f32 %v627_v15 }
 0x5d2   :  { %1470 = vpow2.f32 %v1327_v23 }
 0x5de   :  { %v1469_v21 = vpop.eup %1468 }
 0x5df   :  { %v635_v22 = vmul.f32 %v1469_v21, %v1467_v17  ;;  %v1471_v24 = vpop.eup %1470  ;;  %v634_v28 = vmul.f32 %v1469_v21, %v538_v60 }
 0x5e0   :  { %v628_v26 = vadd.f32 1.0, %v1471_v24 }
 0x5e1   :  { %637 = vrot.lane.b32.xlu0 %v635_v22, %s1556_s14 }
 0x5e2   :  { %1472 = vrcp.f32 %v628_v26 }
 0x5ef   :  { %v1473_v32 = vpop.eup %1472 }
 0x653   :  { %v638_v12 = vpop.permute.xlu0 %637 }
 0x654   :  { %v640_v30 = vadd.f32 %v638_v12, %v634_v28 }
 0x656   :  { %1474 = vtanh.f32 %v640_v30 }
 0x663   :  { %v1475_v14 = vpop.eup %1474 }
 0x664   :  { %v642_v34 = vmul.f32 %v1475_v14, %v1473_v32 }
 0x666   :  { %646 = vrot.lane.b32.xlu1 %v642_v34, %s1556_s14 }
 0x6d8   :  { %v647_v36 = vpop.permute.xlu1 %646 }
 0x6d9   :  { %1328 = vmatmul.mubr.msk.f32.vlgmr.msra.gmra.mxu0 %vm443_vm12, %v647_v36 }
 0x6da   :  { %871 = vmatpush1.msra.mxu0 %v1798_v46  ;;  %918 = vmatprep.mubr.f32.mxu0 %v1553_v5 }
 0x6db   :  { %872 = vmatprep.subr.mxu0 %v1803_v47 }
 0x6dc   :  { %873 = vmatpush1.msra.mxu0 %v1809_v43 }
 0x6dd   :  { %874 = vmatprep.subr.mxu0 %v1816_v48 }
 0x6de   :  { %875 = vmatpush1.msra.mxu0 %v1823_v49 }
 0x6df   :  { %876 = vmatprep.subr.mxu0 %v1830_v50 }
 0x6e0   :  { %877 = vmatpush1.msra.mxu0 %v1837_v51 }
 0x6e1   :  { %878 = vmatprep.subr.mxu0 %v1844_v52 }
 0x6e2   :  { %879 = vmatpush1.msra.mxu0 %v1851_v53 }
 0x6e3   :  { %880 = vmatprep.subr.mxu0 %v1858_v54 }
 0x6e4   :  { %881 = vmatpush1.msra.mxu0 %v1865_v55 }
 0x6e5   :  { %882 = vmatprep.subr.mxu0 %v1872_v56 }
 0x6e6   :  { %883 = vmatpush1.msra.mxu0 %v1879_v57 }
 0x6e7   :  { %884 = vmatprep.subr.mxu0 %v1886_v58 }
 0x6e8   :  { %885 = vmatpush1.msra.mxu0 %v1893_v59 }
 0x6e9   :  { %1074 = vmatprep.subr.mxu0 %v1793_v45 }
 0x799   :  { %v716_v38 = vpop.f32.mrf.mxu0 }
 0x79a   :  { %v721_v40 = vadd.f32 %v716_v38, %v1752_v16 }
 0x79b   :  { %v718_v1 = vpop.f32.mrf.mxu0 }
 0x79c   :  { %v1329_v41 = vmul.f32 -1.442695, %v721_v40  ;;  %v722_v7 = vadd.f32 %v718_v1, %v1755_v18 }
 0x79e   :  { %1476 = vpow2.f32 %v1329_v41  ;;  %v1330_v0 = vmul.f32 -1.442695, %v722_v7 }
 0x79f   :  { %1478 = vtanh.f32 %v722_v7 }
 0x7ab   :  { %v1477_v42 = vpop.eup %1476 }
 0x7ac   :  { %v729_v44 = vadd.f32 1.0, %v1477_v42  ;;  %v1479_v60 = vpop.eup %1478 }
 0x7ae   :  { %1480 = vrcp.f32 %v729_v44 }
 0x7af   :  { %1482 = vpow2.f32 %v1330_v0 }
 0x7bb   :  { %v1481_v9 = vpop.eup %1480 }
 0x7bc   :  { %v737_v61 = vmul.f32 %v1481_v9, %v1479_v60  ;;  %v1483_v2 = vpop.eup %1482  ;;  %v736_v4 = vmul.f32 %v1481_v9, %v640_v30 }
 0x7bd   :  { %v730_v3 = vadd.f32 1.0, %v1483_v2 }
 0x7be   :  { %739 = vrot.lane.b32.xlu0 %v737_v61, %s1556_s14 }
 0x7bf   :  { %1484 = vrcp.f32 %v730_v3 }
 0x7cc   :  { %v1485_v8 = vpop.eup %1484 }
 0x830   :  { %v740_v16 = vpop.permute.xlu0 %739 }
 0x831   :  { %v742_v6 = vadd.f32 %v740_v16, %v736_v4 }
 0x833   :  { %1486 = vtanh.f32 %v742_v6 }
 0x840   :  { %v1487_v18 = vpop.eup %1486 }
 0x841   :  { %v744_v10 = vmul.f32 %v1487_v18, %v1485_v8 }
 0x843   :  { %748 = vrot.lane.b32.xlu1 %v744_v10, %s1556_s14 }
 0x8b5   :  { %v749_v13 = vpop.permute.xlu1 %748 }
 0x8b6   :  { %1331 = vmatmul.mubr.msk.f32.vlgmr.msra.gmra.mxu1 %vm443_vm12, %v749_v13 }
 0x8b7   :  { %973 = vmatpush1.msra.mxu1 %v1798_v46  ;;  %1020 = vmatprep.mubr.f32.mxu1 %v1553_v5 }
 0x8b8   :  { %974 = vmatprep.subr.mxu1 %v1803_v47 }
 0x8b9   :  { %975 = vmatpush1.msra.mxu1 %v1809_v43 }
 0x8ba   :  { %976 = vmatprep.subr.mxu1 %v1816_v48 }
 0x8bb   :  { %977 = vmatpush1.msra.mxu1 %v1823_v49 }
 0x8bc   :  { %978 = vmatprep.subr.mxu1 %v1830_v50 }
 0x8bd   :  { %979 = vmatpush1.msra.mxu1 %v1837_v51 }
 0x8be   :  { %980 = vmatprep.subr.mxu1 %v1844_v52 }
 0x8bf   :  { %981 = vmatpush1.msra.mxu1 %v1851_v53 }
 0x8c0   :  { %982 = vmatprep.subr.mxu1 %v1858_v54 }
 0x8c1   :  { %983 = vmatpush1.msra.mxu1 %v1865_v55 }
 0x8c2   :  { %984 = vmatprep.subr.mxu1 %v1872_v56 }
 0x8c3   :  { %985 = vmatpush1.msra.mxu1 %v1879_v57 }
 0x8c4   :  { %986 = vmatprep.subr.mxu1 %v1886_v58 }
 0x8c5   :  { %987 = vmatpush1.msra.mxu1 %v1893_v59 }
 0x8c6   :  { %1176 = vmatprep.subr.mxu1 %v1793_v45 }
 0x976   :  { %v818_v15 = vpop.f32.mrf.mxu1 }
 0x977   :  { %v823_v17 = vadd.f32 %v818_v15, %v1758_v20 }
 0x978   :  { %v820_v22 = vpop.f32.mrf.mxu1 }
 0x979   :  { %v1332_v21 = vmul.f32 -1.442695, %v823_v17  ;;  %v824_v23 = vadd.f32 %v820_v22, %v1764_v25 }
 0x97b   :  { %1488 = vpow2.f32 %v1332_v21  ;;  %v1333_v32 = vmul.f32 -1.442695, %v824_v23 }
 0x97c   :  { %1490 = vtanh.f32 %v824_v23 }
 0x988   :  { %v1489_v24 = vpop.eup %1488 }
 0x989   :  { %v831_v26 = vadd.f32 1.0, %v1489_v24  ;;  %v1491_v28 = vpop.eup %1490 }
 0x98b   :  { %1492 = vrcp.f32 %v831_v26 }
 0x98c   :  { %1494 = vpow2.f32 %v1333_v32 }
 0x998   :  { %v1493_v12 = vpop.eup %1492 }
 0x999   :  { %v839_v30 = vmul.f32 %v1493_v12, %v1491_v28  ;;  %v1495_v45 = vpop.eup %1494  ;;  %v838_v34 = vmul.f32 %v1493_v12, %v742_v6 }
 0x99a   :  { %v832_v14 = vadd.f32 1.0, %v1495_v45 }
 0x99b   :  { %841 = vrot.lane.b32.xlu0 %v839_v30, %s1556_s14 }
 0x99c   :  { %1496 = vrcp.f32 %v832_v14 }
 0x9a9   :  { %v1497_v38 = vpop.eup %1496 }
 0xa0d   :  { %v842_v20 = vpop.permute.xlu0 %841 }
 0xa0e   :  { %v844_v36 = vadd.f32 %v842_v20, %v838_v34 }
 0xa10   :  { %1498 = vtanh.f32 %v844_v36 }
 0xa1d   :  { %v1499_v25 = vpop.eup %1498 }
 0xa1e   :  { %v846_v40 = vmul.f32 %v1499_v25, %v1497_v38 }
 0xa20   :  { %850 = vrot.lane.b32.xlu1 %v846_v40, %s1556_s14 }
 0xa92   :  { %v851_v41 = vpop.permute.xlu1 %850 }
 0xa93   :  { %1334 = vmatmul.mubr.msk.f32.vlgmr.msra.gmra.mxu0 %vm443_vm12, %v851_v41 }
 0xa94   :  { %1075 = vmatpush1.msra.mxu0 %v1798_v46  ;;  %1122 = vmatprep.mubr.f32.mxu0 %v1553_v5 }
 0xa95   :  { %1076 = vmatprep.subr.mxu0 %v1803_v47 }
 0xa96   :  { %1077 = vmatpush1.msra.mxu0 %v1809_v43 }
 0xa97   :  { %1078 = vmatprep.subr.mxu0 %v1816_v48 }
 0xa98   :  { %1079 = vmatpush1.msra.mxu0 %v1823_v49 }
 0xa99   :  { %1080 = vmatprep.subr.mxu0 %v1830_v50 }
 0xa9a   :  { %1081 = vmatpush1.msra.mxu0 %v1837_v51 }
 0xa9b   :  { %1082 = vmatprep.subr.mxu0 %v1844_v52 }
 0xa9c   :  { %1083 = vmatpush1.msra.mxu0 %v1851_v53 }
 0xa9d   :  { %1084 = vmatprep.subr.mxu0 %v1858_v54 }
 0xa9e   :  { %1085 = vmatpush1.msra.mxu0 %v1865_v55 }
 0xa9f   :  { %1086 = vmatprep.subr.mxu0 %v1872_v56 }
 0xaa0   :  { %1087 = vmatpush1.msra.mxu0 %v1879_v57 }
 0xaa1   :  { %1088 = vmatprep.subr.mxu0 %v1886_v58 }
 0xaa2   :  { %1089 = vmatpush1.msra.mxu0 %v1893_v59 }
 0xb53   :  { %v920_v1 = vpop.f32.mrf.mxu0 }
 0xb54   :  { %v925_v7 = vadd.f32 %v920_v1, %v1767_v27 }
 0xb55   :  { %v922_v44 = vpop.f32.mrf.mxu0 }
 0xb56   :  { %v1335_v42 = vmul.f32 -1.442695, %v925_v7  ;;  %v926_v60 = vadd.f32 %v922_v44, %v1771_v29  ;;  %v1291_v7 = vld [vmem:[%s2062_s2 + $0xa1] ss:$8 sm:$0x3]  ;;  %s1558_s2 = smov 32  }
 0xb58   :  { %1500 = vpow2.f32 %v1335_v42  ;;  %v1336_v4 = vmul.f32 -1.442695, %v926_v60  ;;  %v1259_v42 = vrot.slane %v1291_v7, %v232_v63 }
 0xb59   :  { %1502 = vtanh.f32 %v926_v60 }
 0xb65   :  { %v1501_v9 = vpop.eup %1500 }
 0xb66   :  { %v933_v61 = vadd.f32 1.0, %v1501_v9  ;;  %v1503_v0 = vpop.eup %1502 }
 0xb68   :  { %1504 = vrcp.f32 %v933_v61 }
 0xb69   :  { %1506 = vpow2.f32 %v1336_v4 }
 0xb75   :  { %v1505_v2 = vpop.eup %1504 }
 0xb76   :  { %v941_v3 = vmul.f32 %v1505_v2, %v1503_v0  ;;  %v1507_v16 = vpop.eup %1506  ;;  %v940_v8 = vmul.f32 %v1505_v2, %v844_v36  ;;  %v385_v0 = vadd.f32 %v1924_v19, %v1743_v11 }
 0xb77   :  { %v934_v6 = vadd.f32 1.0, %v1507_v16 }
 0xb78   :  { %943 = vrot.lane.b32.xlu0 %v941_v3, %s1556_s14 }
 0xb79   :  { %1508 = vrcp.f32 %v934_v6 }
 0xb86   :  { %v1509_v10 = vpop.eup %1508 }
 0xbea   :  { %v944_v27 = vpop.permute.xlu0 %943 }
 0xbeb   :  { %v946_v18 = vadd.f32 %v944_v27, %v940_v8 }
 0xbed   :  { %1510 = vtanh.f32 %v946_v18 }
 0xbfa   :  { %v1511_v29 = vpop.eup %1510 }
 0xbfb   :  { %v948_v13 = vmul.f32 %v1511_v29, %v1509_v10 }
 0xbfd   :  { %952 = vrot.lane.b32.xlu1 %v948_v13, %s1556_s14 }
 0xc6f   :  { %v953_v15 = vpop.permute.xlu1 %952 }
 0xc70   :  { %1337 = vmatmul.mubr.msk.f32.vlgmr.msra.gmra.mxu1 %vm443_vm12, %v953_v15 }
 0xc71   :  { %1177 = vmatpush1.msra.mxu1 %v1798_v46  ;;  %1224 = vmatprep.mubr.f32.mxu1 %v1553_v5 }
 0xc72   :  { %1178 = vmatprep.subr.mxu1 %v1803_v47 }
 0xc73   :  { %1179 = vmatpush1.msra.mxu1 %v1809_v43 }
 0xc74   :  { %1180 = vmatprep.subr.mxu1 %v1816_v48 }
 0xc75   :  { %1181 = vmatpush1.msra.mxu1 %v1823_v49 }
 0xc76   :  { %1182 = vmatprep.subr.mxu1 %v1830_v50 }
 0xc77   :  { %1183 = vmatpush1.msra.mxu1 %v1837_v51 }
 0xc78   :  { %1184 = vmatprep.subr.mxu1 %v1844_v52 }
 0xc79   :  { %1185 = vmatpush1.msra.mxu1 %v1851_v53 }
 0xc7a   :  { %1186 = vmatprep.subr.mxu1 %v1858_v54 }
 0xc7b   :  { %1187 = vmatpush1.msra.mxu1 %v1865_v55 }
 0xc7c   :  { %1188 = vmatprep.subr.mxu1 %v1872_v56 }
 0xc7d   :  { %1189 = vmatpush1.msra.mxu1 %v1879_v57 }
 0xc7e   :  { %1190 = vmatprep.subr.mxu1 %v1886_v58 }
 0xc7f   :  { %1191 = vmatpush1.msra.mxu1 %v1893_v59 }
 0xd30   :  { %v1022_v5 = vpop.f32.mrf.mxu1 }
 0xd31   :  { %v1027_v46 = vadd.f32 %v1022_v5, %v1774_v31 }
 0xd32   :  { %v1024_v43 = vpop.f32.mrf.mxu1 }
 0xd33   :  { %v1338_v47 = vmul.f32 -1.442695, %v1027_v46  ;;  %v1028_v48 = vadd.f32 %v1024_v43, %v1777_v33 }
 0xd35   :  { %1512 = vpow2.f32 %v1338_v47  ;;  %v1339_v54 = vmul.f32 -1.442695, %v1028_v48 }
 0xd36   :  { %1514 = vtanh.f32 %v1028_v48 }
 0xd42   :  { %v1513_v49 = vpop.eup %1512 }
 0xd43   :  { %v1035_v50 = vadd.f32 1.0, %v1513_v49  ;;  %v1515_v51 = vpop.eup %1514 }
 0xd45   :  { %1516 = vrcp.f32 %v1035_v50 }
 0xd46   :  { %1518 = vpow2.f32 %v1339_v54 }
 0xd52   :  { %v1517_v52 = vpop.eup %1516 }
 0xd53   :  { %v1043_v53 = vmul.f32 %v1517_v52, %v1515_v51  ;;  %v1519_v55 = vpop.eup %1518  ;;  %v1042_v57 = vmul.f32 %v1517_v52, %v946_v18 }
 0xd54   :  { %v1036_v56 = vadd.f32 1.0, %v1519_v55 }
 0xd55   :  { %1045 = vrot.lane.b32.xlu0 %v1043_v53, %s1556_s14 }
 0xd56   :  { %1520 = vrcp.f32 %v1036_v56 }
 0xd63   :  { %v1521_v59 = vpop.eup %1520 }
 0xdc7   :  { %v1046_v31 = vpop.permute.xlu0 %1045 }
 0xdc8   :  { %v1048_v58 = vadd.f32 %v1046_v31, %v1042_v57 }
 0xdca   :  { %1522 = vtanh.f32 %v1048_v58 }
 0xdd7   :  { %v1523_v33 = vpop.eup %1522 }
 0xdd8   :  { %v1050_v17 = vmul.f32 %v1523_v33, %v1521_v59 }
 0xdda   :  { %1054 = vrot.lane.b32.xlu1 %v1050_v17, %s1556_s14 }
 0xe4c   :  { %v1055_v21 = vpop.permute.xlu1 %1054 }
 0xe4d   :  { %1340 = vmatmul.mubr.msk.f32.vlgmr.msra.gmra.mxu0 %vm443_vm12, %v1055_v21 }
 0xf0d   :  { %v1124_v22 = vpop.f32.mrf.mxu0 }
 0xf0e   :  { %v1129_v23 = vadd.f32 %v1124_v22, %v1780_v35 }
 0xf0f   :  { %v1126_v26 = vpop.f32.mrf.mxu0 }
 0xf10   :  { %v1341_v24 = vmul.f32 -1.442695, %v1129_v23  ;;  %v1130_v28 = vadd.f32 %v1126_v26, %v1783_v37 }
 0xf12   :  { %1524 = vpow2.f32 %v1341_v24  ;;  %v1342_v34 = vmul.f32 -1.442695, %v1130_v28 }
 0xf13   :  { %1526 = vtanh.f32 %v1130_v28 }
 0xf1f   :  { %v1525_v12 = vpop.eup %1524 }
 0xf20   :  { %v1137_v30 = vadd.f32 1.0, %v1525_v12  ;;  %v1527_v32 = vpop.eup %1526 }
 0xf22   :  { %1528 = vrcp.f32 %v1137_v30 }
 0xf23   :  { %1530 = vpow2.f32 %v1342_v34 }
 0xf2f   :  { %v1529_v45 = vpop.eup %1528 }
 0xf30   :  { %v1145_v14 = vmul.f32 %v1529_v45, %v1527_v32  ;;  %v1531_v20 = vpop.eup %1530  ;;  %v1144_v38 = vmul.f32 %v1529_v45, %v1048_v58 }
 0xf31   :  { %v1138_v36 = vadd.f32 1.0, %v1531_v20 }
 0xf32   :  { %1147 = vrot.lane.b32.xlu0 %v1145_v14, %s1556_s14 }
 0xf33   :  { %1532 = vrcp.f32 %v1138_v36 }
 0xf40   :  { %v1533_v40 = vpop.eup %1532 }
 0xfa4   :  { %v1148_v35 = vpop.permute.xlu0 %1147 }
 0xfa5   :  { %v1150_v25 = vadd.f32 %v1148_v35, %v1144_v38 }
 0xfa7   :  { %1534 = vtanh.f32 %v1150_v25 }
 0xfb4   :  { %v1535_v37 = vpop.eup %1534 }
 0xfb5   :  { %v1152_v41 = vmul.f32 %v1535_v37, %v1533_v40 }
 0xfb7   :  { %1156 = vrot.lane.b32.xlu1 %v1152_v41, %s1556_s14 }
 0xfbb   :  { %1260 = vrot.lane.b32.xlu1 %v1259_v42, %s1557_s22 }
0x1029   :  { %v1157_v1 = vpop.permute.xlu1 %1156 }
0x102a   :  { %1343 = vmatmul.mubr.msk.f32.vlgmr.msra.gmra.mxu1 %vm443_vm12, %v1157_v1 }
0x102d   :  { %v1261_v29 = vpop.permute.xlu1 %1260 }
0x10ea   :  { %v1226_v44 = vpop.f32.mrf.mxu1 }
0x10eb   :  { %v1231_v60 = vadd.f32 %v1226_v44, %v1786_v39 }
0x10ec   :  { %v1228_v61 = vpop.f32.mrf.mxu1 }
0x10ed   :  { %v1344_v9 = vmul.f32 -1.442695, %v1231_v60  ;;  %v1232_v2 = vadd.f32 %v1228_v61, %v385_v0 }
0x10ef   :  { %1536 = vpow2.f32 %v1344_v9  ;;  %v1345_v6 = vmul.f32 -1.442695, %v1232_v2 }
0x10f0   :  { %1538 = vtanh.f32 %v1232_v2 }
0x10fc   :  { %v1537_v3 = vpop.eup %1536 }
0x10fd   :  { %v1239_v4 = vadd.f32 1.0, %v1537_v3  ;;  %v1539_v16 = vpop.eup %1538 }
0x10ff   :  { %1540 = vrcp.f32 %v1239_v4 }
0x1100   :  { %1542 = vpow2.f32 %v1345_v6 }
0x110c   :  { %v1541_v62 = vpop.eup %1540 }
0x110d   :  { %v1247_v63 = vmul.f32 %v1541_v62, %v1539_v16  ;;  %v1543_v8 = vpop.eup %1542  ;;  %v1246_v27 = vmul.f32 %v1541_v62, %v1150_v25 }
0x110e   :  { %v1240_v39 = vadd.f32 1.0, %v1543_v8 }
0x110f   :  { %1249 = vrot.lane.b32.xlu0 %v1247_v63, %s1556_s14 }
0x1110   :  { %1544 = vrcp.f32 %v1240_v39 }
0x111d   :  { %v1545_v11 = vpop.eup %1544 }
0x1181   :  { %v1250_v18 = vpop.permute.xlu0 %1249 }
0x1182   :  { %v1252_v10 = vadd.f32 %v1250_v18, %v1246_v27 }
0x1184   :  { %1546 = vtanh.f32 %v1252_v10 }
0x1191   :  { %v1547_v19 = vpop.eup %1546 }
0x1192   :  { %v1254_v13 = vmul.f32 %v1547_v19, %v1545_v11 }
0x1194   :  { %v1263_v15 = vmul.f32 %v1261_v29, %v1254_v13 }
0x1196   :  { %1265 = vrot.lane.b32.xlu0 %v1263_v15, %s1558_s2 }
0x1208   :  { %v1266_v5 = vpop.permute.xlu0 %1265 }
0x1209   :  { %v1269_v46 = vsel %vm1268_vm13, %v1266_v5, 0.0 }
0x120a   :  { %1270 = vadd.xlane.f32.xlu1 %v1269_v46 }
0x1293   :  { %v1271_v47 = vpop.xlane.xlu1 %1270 }
0x1294   :  { %v1273_v43 = vadd.f32 %v1271_v47, %v1259_v42 }
0x1296   :  { %v1346_v48 = vmul.f32 -1.442695, %v1273_v43 }
0x1298   :  { %1548 = vpow2.f32 %v1346_v48 }
0x12a5   :  { %v1549_v49 = vpop.eup %1548 }
0x12a6   :  { %v1277_v50 = vadd.f32 1.0, %v1549_v49 }
0x12a8   :  { %1550 = vrcp.f32 %v1277_v50 }
0x12b5   :  { %v1551_v51 = vpop.eup %1550 }
0x12b6   :  { %1281 = vrot.lane.b32.xlu0 %v1551_v51, %s1557_s22 }
0x1328   :  { %v1282_v52 = vpop.permute.xlu0 %1281 }
0x1329   :  { %1285 = vst.msk [vmem:[%s2063_s3] sm:$0xff] %vm1284_vm14, %v1282_v52 }

</bundles_post_ra>
